<compile_context>
chip_gen: v7x
topology: tpu7x:2x2x1
jax: 0.10.0
libtpu: 0.0.40
codegen_flags: <defaults>
</compile_context>

<pallas_src>
import functools

import jax
import jax.numpy as jnp
from jax.experimental import pallas as pl
from jax.experimental.pallas import tpu as pltpu


def _ggcnn4_kernel(cin, x_ref, wf_ref, bf_ref, w1s_ref, b1s_ref,
                   w2c_ref, b2s_ref, out_ref):
    """Fused GGCNN4 kernel: one (Cin, T) lane tile in, one (4, T) tile out.

    x_ref  : (Cin, T)  input pixels, channel-major, f32
    wf_ref : (16, Cin) feature 1x1 conv weight, f32
    bf_ref : (16, 1)   feature 1x1 conv bias, f32
    w1s_ref: (64, 16)  stacked, BN-folded first 1x1 conv weights, bf16
    b1s_ref: (64, 1)   stacked, BN-folded first 1x1 conv biases, f32
    w2c_ref: (64, 1)   second 1x1 conv weights stacked as a column, f32
    b2s_ref: (4, 1)    second 1x1 conv biases, f32
    out_ref: (4, T)    rows = [pos, cos, sin, width]
    """
    x = x_ref[...]

    # Feature extractor (UNet stand-in): 1x1 conv + ReLU -> (16, T) f32.
    if cin < 8:
        # Tiny contraction -> VPU broadcast mul-add; input stays unpadded in HBM.
        feat = bf_ref[...]
        for c in range(cin):
            feat = feat + wf_ref[:, c:c + 1] * x[c:c + 1, :]
    else:
        feat = jnp.dot(wf_ref[...].astype(jnp.bfloat16),
                       x.astype(jnp.bfloat16),
                       preferred_element_type=jnp.float32) + bf_ref[...]
    feat = jnp.maximum(feat, 0.0)

    # All four heads' first conv (BN folded) as ONE (64,16)@(16,T) MXU matmul,
    # bf16 operands + f32 accumulate (single-pass MXU).
    z = jnp.dot(w1s_ref[...], feat.astype(jnp.bfloat16),
                preferred_element_type=jnp.float32) + b1s_ref[...]    # (64, T)

    # Per-head activation + second 1x1 conv on the VPU/XLU (f32):
    #   out[h] = sum_c w2[h, c] * act(z[16*h + c])
    # No (64, T) activation buffer is ever materialized, and the 4x-larger
    # second-conv RHS never hits the MXU.
    w2c = w2c_ref[...]                                                # (64, 1)

    def head(lo, hi, act):
        a = act(z[lo:hi, :])                                          # (16, T)
        return jnp.sum(a * w2c[lo:hi, :], axis=0, keepdims=True)      # (1, T)

    relu = lambda t: jnp.maximum(t, 0.0)
    rows = [head(0, 16, relu),         # pos   (ReLU)
            head(16, 32, jnp.tanh),    # cos   (Tanh)
            head(32, 48, jnp.tanh),    # sin   (Tanh)
            head(48, 64, relu)]        # width (ReLU)

    out = jnp.concatenate(rows, axis=0) + b2s_ref[...]                # (4, T)
    out_ref[...] = out.astype(out_ref.dtype)       # one lane-dense block store


def ggcnn4_forward(x_nchw, params, *, lane_tile=8192, out_dtype=jnp.float32):
    """GGCNN4 forward. x_nchw: (N, Cin, H, W) float32.

    lane_tile : pixels per grid step (multiple of 128). Sweep 8192-32768 per
                TPU generation; 8192 amortizes the ~0.35us grid-step overhead
                while staying far below v7x's 64 MiB per-core VMEM.
    out_dtype : jnp.float32 (default) or jnp.bfloat16 to halve the dominant
                output write stream (recommended on v5e).
    """
    N, Cin, H, W = x_nchw.shape
    assert lane_tile % 128 == 0, "lane_tile must be a multiple of 128"

    # Channel-major view without any HBM transpose (pure reshapes only).
    if Cin == 1:
        G, hw = 1, N * H * W
    else:
        G, hw = N, H * W
    x3d = x_nchw.reshape(G, Cin, hw)

    # Lane-tile selection: as large as allowed, but keep >= ~8 total grid steps
    # (2 TCs on v7x x ~4 for balance) when shrinking is cheap.
    hw_128 = ((hw + 127) // 128) * 128
    tile = min(lane_tile, hw_128)
    while tile > 1024 and G * pl.cdiv(hw_128, tile) < 8 and tile % 256 == 0:
        tile //= 2
    hw_pad = pl.cdiv(hw, tile) * tile
    if hw_pad != hw:
        x3d = jnp.pad(x3d, ((0, 0), (0, 0), (0, hw_pad - hw)))
    num_tiles = hw_pad // tile

    # Fold eval-mode BatchNorm into the first conv, stack the four heads, and
    # pre-cast the MXU weight to bf16 (accumulation stays f32 in the kernel).
    sc, sh = params["bn_scale"], params["bn_shift"]                   # (4,16,1)
    w1s = (sc * params["w1"]).reshape(64, 16).astype(jnp.bfloat16)    # (64,16)
    b1s = (sc * params["b1"] + sh).reshape(64, 1).astype(jnp.float32)
    w2c = params["w2"].reshape(64, 1).astype(jnp.float32)  # rows 16h..16h+15 = head h
    b2s = params["b2"].reshape(4, 1).astype(jnp.float32)

    # Explicit VMEM budget: double-buffered I/O blocks plus (64,T)/(16,T)
    # temporaries with 2x slack, capped below v7x's 64 MiB per-core VMEM.
    est = 2 * (Cin + 4) * tile * 4 + (64 + 16 + 40) * tile * 4
    vmem_limit = int(min(56 * 2**20, max(32 * 2**20, 2 * est)))

    out = pl.pallas_call(
        functools.partial(_ggcnn4_kernel, Cin),
        out_shape=jax.ShapeDtypeStruct((G, 4, hw_pad), out_dtype),
        grid=(G, num_tiles),
        in_specs=[
            pl.BlockSpec((None, Cin, tile), lambda g, i: (g, 0, i)),  # input tile
            pl.BlockSpec((16, Cin), lambda g, i: (0, 0)),             # weights stay
            pl.BlockSpec((16, 1), lambda g, i: (0, 0)),               #  VMEM-resident
            pl.BlockSpec((64, 16), lambda g, i: (0, 0)),              #  (constant
            pl.BlockSpec((64, 1), lambda g, i: (0, 0)),               #   index maps)
            pl.BlockSpec((64, 1), lambda g, i: (0, 0)),
            pl.BlockSpec((4, 1), lambda g, i: (0, 0)),
        ],
        out_specs=pl.BlockSpec((None, 4, tile), lambda g, i: (g, 0, i)),
        compiler_params=pltpu.CompilerParams(
            dimension_semantics=("parallel", "parallel"),
            vmem_limit_bytes=vmem_limit),
    )(x3d, params["wf"], params["bf"], w1s, b1s, w2c, b2s)

    out = out[:, :, :hw]                                     # drop lane padding
    return tuple(out[:, h, :].reshape(N, 1, H, W) for h in range(4))


def make_params(key, input_channels=1, eps=1e-5):
    """Deterministic synthetic parameters (shapes match the PyTorch module)."""
    ks = jax.random.split(key, 10)
    f32 = jnp.float32
    # UNet stand-in: Conv2d(input_channels, 16, 1)
    wf = 0.1 * jax.random.normal(ks[0], (16, input_channels), f32)
    bf = 0.1 * jax.random.normal(ks[1], (16, 1), f32)
    # 4 heads, each: Conv2d(16,16,1) -> BatchNorm2d(16) -> act -> Conv2d(16,1,1)
    w1 = 0.1 * jax.random.normal(ks[2], (4, 16, 16), f32)
    b1 = 0.1 * jax.random.normal(ks[3], (4, 16, 1), f32)
    gamma = 1.0 + 0.1 * jax.random.normal(ks[4], (4, 16, 1), f32)
    beta = 0.1 * jax.random.normal(ks[5], (4, 16, 1), f32)
    mean = 0.1 * jax.random.normal(ks[6], (4, 16, 1), f32)
    var = jnp.abs(0.1 * jax.random.normal(ks[7], (4, 16, 1), f32)) + 1.0
    w2 = 0.1 * jax.random.normal(ks[8], (4, 1, 16), f32)
    b2 = 0.1 * jax.random.normal(ks[9], (4, 1, 1), f32)
    # Fold eval-mode BatchNorm into scale/shift.
    scale = gamma * jax.lax.rsqrt(var + eps)
    shift = beta - mean * scale
    return {"wf": wf, "bf": bf, "w1": w1, "b1": b1,
            "bn_scale": scale, "bn_shift": shift, "w2": w2, "b2": b2}


def ggcnn4_reference(x_nchw, params, *, bf16_matmul=False):
    """Pure-JAX reference.

    bf16_matmul=False : module semantics, f32 HIGHEST precision.
    bf16_matmul=True  : mimics the kernel's numerics (BN folded pre-cast,
                        bf16 MXU operands, f32 accumulate) for a tight check.
    """
    N, Cin, H, W = x_nchw.shape
    hp = jax.lax.Precision.HIGHEST
    bf16, f32 = jnp.bfloat16, jnp.float32
    x2d = jnp.transpose(x_nchw, (1, 0, 2, 3)).reshape(Cin, N * H * W)
    if bf16_matmul and Cin >= 8:
        feat = jnp.dot(params["wf"].astype(bf16), x2d.astype(bf16),
                       preferred_element_type=f32) + params["bf"]
    else:
        feat = jnp.dot(params["wf"], x2d, precision=hp) + params["bf"]
    feat = jnp.maximum(feat, 0.0)
    sc, sh = params["bn_scale"], params["bn_shift"]
    outs = []
    for h in range(4):
        if bf16_matmul:
            w1f = (sc[h] * params["w1"][h]).astype(bf16)
            b1f = sc[h] * params["b1"][h] + sh[h]
            pre = jnp.dot(w1f, feat.astype(bf16),
                          preferred_element_type=f32) + b1f
        else:
            pre = sc[h] * (jnp.dot(params["w1"][h], feat, precision=hp)
                           + params["b1"][h]) + sh[h]
        act = jnp.maximum(pre, 0.0) if h in (0, 3) else jnp.tanh(pre)
        o = jnp.dot(params["w2"][h], act, precision=hp) + params["b2"][h]
        outs.append(o.reshape(N, 1, H, W))
    return tuple(outs)


if __name__ == "__main__":
    key = jax.random.PRNGKey(0)
    k1, k2, k3, k4 = jax.random.split(key, 4)

    def run_case(input_channels, N, H, W, k_x, k_p):
        x = jax.random.normal(k_x, (N, input_channels, H, W), jnp.float32)
        params = make_params(k_p, input_channels=input_channels)
        fwd = jax.jit(functools.partial(ggcnn4_forward, lane_tile=8192))
        got = fwd(x, params)
        jax.block_until_ready(got)
        ref_matched = ggcnn4_reference(x, params, bf16_matmul=True)
        ref_module = ggcnn4_reference(x, params, bf16_matmul=False)
        for g, rm, rf in zip(got, ref_matched, ref_module):
            assert g.shape == (N, 1, H, W), g.shape
            assert jnp.allclose(g, rm, atol=1e-3, rtol=1e-3), \
                "mismatch vs precision-matched reference"
            assert jnp.allclose(g, rf, atol=2e-2, rtol=2e-2), \
                "mismatch vs f32 module reference"

    # PyTorch default: Cin=1 (whole batch on the lane axis, VPU feature conv).
    run_case(1, 2, 32, 32, k1, k2)
    # Cin>=8 path: MXU feature conv + per-batch grid axis (no HBM transpose).
    run_case(8, 2, 16, 16, k3, k4)

    print("KERNEL_OK")
</pallas_src>

<mosaic_0001>
module attributes {stable_mosaic.version = 11 : i64} {
  func.func @_ggcnn4_kernel(%arg0: i32, %arg1: i32, %arg2: memref<1x1x1024xf32, #tpu.memory_space<vmem>>, %arg3: memref<16x1xf32, #tpu.memory_space<vmem>>, %arg4: memref<16x1xf32, #tpu.memory_space<vmem>>, %arg5: memref<64x16xbf16, #tpu.memory_space<vmem>>, %arg6: memref<64x1xf32, #tpu.memory_space<vmem>>, %arg7: memref<64x1xf32, #tpu.memory_space<vmem>>, %arg8: memref<4x1xf32, #tpu.memory_space<vmem>>, %arg9: memref<1x4x1024xf32, #tpu.memory_space<vmem>>) attributes {dimension_semantics = [#tpu.dimension_semantics<parallel>, #tpu.dimension_semantics<parallel>], iteration_bounds = array<i64: 1, 2>, scalar_prefetch = 0 : i64, scratch_operands = 0 : i64, tpu.core_type = #tpu.core_type<tc>, window_params = [{transform_indices = @transform_0, window_bounds = array<i64: 1, 1, 1024>}, {pipeline_mode = #tpu.pipeline_mode<synchronous>, transform_indices = @transform_1, window_bounds = array<i64: 16, 1>}, {pipeline_mode = #tpu.pipeline_mode<synchronous>, transform_indices = @transform_2, window_bounds = array<i64: 16, 1>}, {pipeline_mode = #tpu.pipeline_mode<synchronous>, transform_indices = @transform_3, window_bounds = array<i64: 64, 16>}, {pipeline_mode = #tpu.pipeline_mode<synchronous>, transform_indices = @transform_4, window_bounds = array<i64: 64, 1>}, {pipeline_mode = #tpu.pipeline_mode<synchronous>, transform_indices = @transform_5, window_bounds = array<i64: 64, 1>}, {pipeline_mode = #tpu.pipeline_mode<synchronous>, transform_indices = @transform_6, window_bounds = array<i64: 4, 1>}, {transform_indices = @transform_7, window_bounds = array<i64: 1, 4, 1024>}]} {
    %c0 = arith.constant 0 : index
    %c0_0 = arith.constant 0 : index
    %c0_1 = arith.constant 0 : index
    %0 = vector.load %arg2[%c0, %c0_0, %c0_1] : memref<1x1x1024xf32, #tpu.memory_space<vmem>>, vector<1x1x1024xf32>
    %1 = vector.shape_cast %0 : vector<1x1x1024xf32> to vector<1x1024xf32>
    %c0_2 = arith.constant 0 : index
    %c0_3 = arith.constant 0 : index
    %2 = vector.load %arg4[%c0_2, %c0_3] : memref<16x1xf32, #tpu.memory_space<vmem>>, vector<16x1xf32>
    %c0_4 = arith.constant 0 : index
    %c0_5 = arith.constant 0 : index
    %3 = vector.load %arg3[%c0_4, %c0_5] : memref<16x1xf32, #tpu.memory_space<vmem>>, vector<16x1xf32>
    %4 = vector.broadcast %3 : vector<16x1xf32> to vector<16x1024xf32>
    %5 = vector.broadcast %1 : vector<1x1024xf32> to vector<16x1024xf32>
    %6 = arith.mulf %4, %5 : vector<16x1024xf32>
    %7 = vector.broadcast %2 : vector<16x1xf32> to vector<16x1024xf32>
    %8 = arith.addf %7, %6 : vector<16x1024xf32>
    %cst = arith.constant 0.000000e+00 : f32
    %9 = vector.broadcast %cst : f32 to vector<16x1024xf32>
    %10 = arith.maximumf %8, %9 : vector<16x1024xf32>
    %c0_6 = arith.constant 0 : index
    %c0_7 = arith.constant 0 : index
    %11 = vector.load %arg5[%c0_6, %c0_7] : memref<64x16xbf16, #tpu.memory_space<vmem>>, vector<64x16xbf16>
    %12 = arith.truncf %10 : vector<16x1024xf32> to vector<16x1024xbf16>
    %cst_8 = arith.constant dense<0.000000e+00> : vector<64x1024xf32>
    %13 = tpu.matmul %11, %12, %cst_8 {dimension_numbers = #tpu.dot_dimension_numbers<[1], [0], [0], [1], [0, 0, 1, 1], [], []>} : vector<64x16xbf16>, vector<16x1024xbf16>, vector<64x1024xf32> -> vector<64x1024xf32>
    %c0_9 = arith.constant 0 : index
    %c0_10 = arith.constant 0 : index
    %14 = vector.load %arg6[%c0_9, %c0_10] : memref<64x1xf32, #tpu.memory_space<vmem>>, vector<64x1xf32>
    %15 = vector.broadcast %14 : vector<64x1xf32> to vector<64x1024xf32>
    %16 = arith.addf %13, %15 : vector<64x1024xf32>
    %c0_11 = arith.constant 0 : index
    %c0_12 = arith.constant 0 : index
    %17 = vector.load %arg7[%c0_11, %c0_12] : memref<64x1xf32, #tpu.memory_space<vmem>>, vector<64x1xf32>
    %18 = vector.extract_strided_slice %16 {offsets = [0, 0], sizes = [16, 1024], strides = [1, 1]} : vector<64x1024xf32> to vector<16x1024xf32>
    %cst_13 = arith.constant 0.000000e+00 : f32
    %19 = vector.broadcast %cst_13 : f32 to vector<16x1024xf32>
    %20 = arith.maximumf %18, %19 : vector<16x1024xf32>
    %21 = vector.extract_strided_slice %17 {offsets = [0, 0], sizes = [16, 1], strides = [1, 1]} : vector<64x1xf32> to vector<16x1xf32>
    %22 = vector.broadcast %21 : vector<16x1xf32> to vector<16x1024xf32>
    %23 = arith.mulf %20, %22 : vector<16x1024xf32>
    %cst_14 = arith.constant dense<0.000000e+00> : vector<1024xf32>
    %24 = vector.multi_reduction <add>, %23, %cst_14 [0] : vector<16x1024xf32> to vector<1024xf32>
    %25 = vector.shape_cast %24 : vector<1024xf32> to vector<1x1024xf32>
    %26 = vector.extract_strided_slice %16 {offsets = [16, 0], sizes = [16, 1024], strides = [1, 1]} : vector<64x1024xf32> to vector<16x1024xf32>
    %27 = math.tanh %26 : vector<16x1024xf32>
    %28 = vector.extract_strided_slice %17 {offsets = [16, 0], sizes = [16, 1], strides = [1, 1]} : vector<64x1xf32> to vector<16x1xf32>
    %29 = vector.broadcast %28 : vector<16x1xf32> to vector<16x1024xf32>
    %30 = arith.mulf %27, %29 : vector<16x1024xf32>
    %cst_15 = arith.constant dense<0.000000e+00> : vector<1024xf32>
    %31 = vector.multi_reduction <add>, %30, %cst_15 [0] : vector<16x1024xf32> to vector<1024xf32>
    %32 = vector.shape_cast %31 : vector<1024xf32> to vector<1x1024xf32>
    %33 = vector.extract_strided_slice %16 {offsets = [32, 0], sizes = [16, 1024], strides = [1, 1]} : vector<64x1024xf32> to vector<16x1024xf32>
    %34 = math.tanh %33 : vector<16x1024xf32>
    %35 = vector.extract_strided_slice %17 {offsets = [32, 0], sizes = [16, 1], strides = [1, 1]} : vector<64x1xf32> to vector<16x1xf32>
    %36 = vector.broadcast %35 : vector<16x1xf32> to vector<16x1024xf32>
    %37 = arith.mulf %34, %36 : vector<16x1024xf32>
    %cst_16 = arith.constant dense<0.000000e+00> : vector<1024xf32>
    %38 = vector.multi_reduction <add>, %37, %cst_16 [0] : vector<16x1024xf32> to vector<1024xf32>
    %39 = vector.shape_cast %38 : vector<1024xf32> to vector<1x1024xf32>
    %40 = vector.extract_strided_slice %16 {offsets = [48, 0], sizes = [16, 1024], strides = [1, 1]} : vector<64x1024xf32> to vector<16x1024xf32>
    %cst_17 = arith.constant 0.000000e+00 : f32
    %41 = vector.broadcast %cst_17 : f32 to vector<16x1024xf32>
    %42 = arith.maximumf %40, %41 : vector<16x1024xf32>
    %43 = vector.extract_strided_slice %17 {offsets = [48, 0], sizes = [16, 1], strides = [1, 1]} : vector<64x1xf32> to vector<16x1xf32>
    %44 = vector.broadcast %43 : vector<16x1xf32> to vector<16x1024xf32>
    %45 = arith.mulf %42, %44 : vector<16x1024xf32>
    %cst_18 = arith.constant dense<0.000000e+00> : vector<1024xf32>
    %46 = vector.multi_reduction <add>, %45, %cst_18 [0] : vector<16x1024xf32> to vector<1024xf32>
    %47 = vector.shape_cast %46 : vector<1024xf32> to vector<1x1024xf32>
    %48 = tpu.concatenate %25, %32, %39, %47 in 0 : vector<1x1024xf32>, vector<1x1024xf32>, vector<1x1024xf32>, vector<1x1024xf32> -> vector<4x1024xf32>
    %c0_19 = arith.constant 0 : index
    %c0_20 = arith.constant 0 : index
    %49 = vector.load %arg8[%c0_19, %c0_20] : memref<4x1xf32, #tpu.memory_space<vmem>>, vector<4x1xf32>
    %50 = vector.broadcast %49 : vector<4x1xf32> to vector<4x1024xf32>
    %51 = arith.addf %48, %50 : vector<4x1024xf32>
    %c0_21 = arith.constant 0 : index
    %c0_22 = arith.constant 0 : index
    %c0_23 = arith.constant 0 : index
    %52 = vector.load %arg9[%c0_21, %c0_22, %c0_23] : memref<1x4x1024xf32, #tpu.memory_space<vmem>>, vector<1x4x1024xf32>
    %53 = vector.shape_cast %52 : vector<1x4x1024xf32> to vector<4x1024xf32>
    %54 = vector.shape_cast %51 : vector<4x1024xf32> to vector<1x4x1024xf32>
    tpu.vector_store %arg9[%c0_21, %c0_22, %c0_23], %54 {strides = array<i32>} : memref<1x4x1024xf32, #tpu.memory_space<vmem>>, vector<1x4x1024xf32>,
    return
  }
  func.func @transform_0(%arg0: i32, %arg1: i32) -> (i32, i32, i32) {
    %c0_i32 = arith.constant 0 : i32
    %c0_i32_0 = arith.constant 0 : i32
    return %arg0, %c0_i32, %arg1 : i32, i32, i32
  }
  func.func @transform_1(%arg0: i32, %arg1: i32) -> (i32, i32) {
    %c0_i32 = arith.constant 0 : i32
    %c0_i32_0 = arith.constant 0 : i32
    %c0_i32_1 = arith.constant 0 : i32
    return %c0_i32, %c0_i32_0 : i32, i32
  }
  func.func @transform_2(%arg0: i32, %arg1: i32) -> (i32, i32) {
    %c0_i32 = arith.constant 0 : i32
    %c0_i32_0 = arith.constant 0 : i32
    %c0_i32_1 = arith.constant 0 : i32
    return %c0_i32, %c0_i32_0 : i32, i32
  }
  func.func @transform_3(%arg0: i32, %arg1: i32) -> (i32, i32) {
    %c0_i32 = arith.constant 0 : i32
    %c0_i32_0 = arith.constant 0 : i32
    %c0_i32_1 = arith.constant 0 : i32
    return %c0_i32, %c0_i32_0 : i32, i32
  }
  func.func @transform_4(%arg0: i32, %arg1: i32) -> (i32, i32) {
    %c0_i32 = arith.constant 0 : i32
    %c0_i32_0 = arith.constant 0 : i32
    %c0_i32_1 = arith.constant 0 : i32
    return %c0_i32, %c0_i32_0 : i32, i32
  }
  func.func @transform_5(%arg0: i32, %arg1: i32) -> (i32, i32) {
    %c0_i32 = arith.constant 0 : i32
    %c0_i32_0 = arith.constant 0 : i32
    %c0_i32_1 = arith.constant 0 : i32
    return %c0_i32, %c0_i32_0 : i32, i32
  }
  func.func @transform_6(%arg0: i32, %arg1: i32) -> (i32, i32) {
    %c0_i32 = arith.constant 0 : i32
    %c0_i32_0 = arith.constant 0 : i32
    %c0_i32_1 = arith.constant 0 : i32
    return %c0_i32, %c0_i32_0 : i32, i32
  }
  func.func @transform_7(%arg0: i32, %arg1: i32) -> (i32, i32, i32) {
    %c0_i32 = arith.constant 0 : i32
    %c0_i32_0 = arith.constant 0 : i32
    return %arg0, %c0_i32, %arg1 : i32, i32, i32
  }
}

</mosaic_0001>

<bundles_post_ra>
// kernel: squeeze.7
= control target key start
LH: loop header
LB: loop body
LE: loop exit
PB: predicated region body
PF: predicated region fallthrough
CT: control target
= control target key end

     0   :  { %vm4_vm0 = vcmask 261120   ;;  %s93_s10 = smov 96   ;;  %s132_s0 = inlined_call_operand.vmem [shape: f32[2048], index: 0, kind: input, shape index: {}]   ;;  %s133_s1 = inlined_call_operand.hbm [shape: f32[2,1,32,32], index: 1, kind: output, shape index: {}]  }
   0x1   :  { %v24_v0 = vld [vmem:[%s132_s0] sm:$0xff]   ;;  %v62_v1 = vld [vmem:[%s132_s0 + $0x8] sm:$0xff]   ;;  %s92_s0 = smov 64  }
   0x2   :  { %25 = vrot.lane.b32.xlu1 %v24_v0, %s92_s0  ;;  %12 = vrot.lane.b32.xlu0 %v24_v0, %s93_s10 }
   0x3   :  { %2 = vsyncpa [#allocation1], 0  ;;  %5 = vst.msk [vmem:[#allocation0] ss:$4 sm:$0xff] %vm4_vm0, %v24_v0   ;;  %s94_s11 = smov 32   ;;  %s95_s12 = smov [#allocation0]  }
   0x4   :  { %10 = vst.msk [vmem:[#allocation0 + $0x20] ss:$4 sm:$0xff] %vm4_vm0, %v62_v1   ;;  %s54_s13 = sshll.u32 %s95_s12, 4  ;;  %s55_s13 = int_to_ptr.vmem [resolvable:$true] %s54_s13 }
   0x5   :  { %s68_s14 = scalar_lea.vmem %s55_s13, 1024  ;;  %p73_p1 = scmp.lt.s32.totalorder %s55_s13, %s55_s13 }
   0x6   :  { %32 = vrot.lane.b32.xlu1 %v62_v1, %s92_s0  ;;  %19 = vrot.lane.b32.xlu0 %v62_v1, %s93_s10  ;;  %p69_p0 = scmp.ne.s32.totalorder %s55_s13, %s68_s14  ;;  %p74_p2 = scmp.lt.s32.totalorder %s68_s14, %s68_s14 }
   0x8   :  { %p75_p3 = por %p74_p2, %p73_p1 }
   0xa   :  { %45 = vrot.lane.b32.xlu1 %v62_v1, %s94_s11  ;;  %38 = vrot.lane.b32.xlu0 %v24_v0, %s94_s11  ;;  %p76_p4 = pnand %p75_p3, %p69_p0 }
  0x74   :  { %v26_v2 = vpop.permute.xlu1 %25   ;;  %v13_v3 = vpop.permute.xlu0 %12  }
  0x75   :  { %29 = vst.msk [vmem:[#allocation0 + $0x2] ss:$4 sm:$0xff] %vm4_vm0, %v26_v2   ;;  %16 = vst.msk [vmem:[#allocation0 + $0x1] ss:$4 sm:$0xff] %vm4_vm0, %v13_v3  }
  0x78   :  { %v33_v4 = vpop.permute.xlu1 %32   ;;  %v20_v5 = vpop.permute.xlu0 %19  }
  0x79   :  { %36 = vst.msk [vmem:[#allocation0 + $0x22] ss:$4 sm:$0xff] %vm4_vm0, %v33_v4   ;;  %23 = vst.msk [vmem:[#allocation0 + $0x21] ss:$4 sm:$0xff] %vm4_vm0, %v20_v5  }
  0x7c   :  { %v46_v6 = vpop.permute.xlu1 %45   ;;  %v39_v7 = vpop.permute.xlu0 %38  }
  0x7d   :  { %49 = vst.msk [vmem:[#allocation0 + $0x23] ss:$4 sm:$0xff] %vm4_vm0, %v46_v6   ;;  %42 = vst.msk [vmem:[#allocation0 + $0x3] ss:$4 sm:$0xff] %vm4_vm0, %v39_v7  }
  0x7e   :  { %79 = shalt.err (!%p76_p4)
}
  0x7f   :  { %s80_s17 = scalar_lea.hbm %s133_s1, 1024 }
  0x80   :  { %p81_p5 = scmp.ne.s32.totalorder %s133_s1, %s80_s17  ;;  %p84_p6 = scmp.lt.u32.totalorder %s80_s17, %s133_s1 }
  0x82   :  { %p86_p7 = pnand %p84_p6, %p81_p5 }
  0x84   :  { %89 = shalt.err (!%p86_p7)
}
  0x85   :  { %57 = dma.vmem_to_hbm [thread:$0]  %s55_s13, 1024, %s133_s1, [#allocation1]  }
  0x86   :  { %90 = dma.done.wait [#allocation1], 1024  }
  0x87   :  { %91 = vsyncadd [#allocation1], 4294966272 }
  0x88   :  { %59 = vsyncpa [#allocation1], 1 }

// kernel: ggcnn4_forward.1
= control target key start
LH: loop header
LB: loop body
LE: loop exit
PB: predicated region body
PF: predicated region fallthrough
CT: control target
= control target key end

     0   :  { %s1554_s24 = smov 0   ;;  %s1556_s25 = smov 0   ;;  %s2058_s0 = inlined_call_operand.vmem [shape: f32[1,1,2048], index: 0, kind: input, shape index: {}]   ;;  %s2059_s1 = inlined_call_operand.vmem [shape: f32[16,1], index: 1, kind: input, shape index: {}]   ;;  %s2060_s2 = inlined_call_operand.vmem [shape: f32[16,1], index: 2, kind: input, shape index: {}]   ;;  %s2061_s3 = inlined_call_operand.vmem [shape: bf16[64,16], index: 3, kind: input, shape index: {}]   ;;  %s2062_s4 = inlined_call_operand.vmem [shape: f32[64,1], index: 4, kind: input, shape index: {}]   ;;  %s2063_s5 = inlined_call_operand.vmem [shape: f32[64,1], index: 5, kind: input, shape index: {}]   ;;  %s2064_s6 = inlined_call_operand.vmem [shape: f32[4,1], index: 6, kind: input, shape index: {}]   ;;  %s2065_s7 = inlined_call_operand.vmem [shape: f32[1,4,2048], index: 7, kind: output, shape index: {}]  }
   0x1   :  { %s1558_s26 = smov 0  }
   0x2 LB: > { %s26_s27 = sadd.s32 1, %s1507_s25  ;;  %p1368_p0 = scmp.ge.s32.totalorder %s1511_s26, 1  ;;  %s1511_s26 = sphi %s1558_s26, %s17_s26   ;;  %s1507_s25 = sphi %s1556_s25, %s2083_s25   ;;  %s1503_s24 = sphi %s1554_s24, %s2082_s24  }
   0x3   : > { %p27_p1 = scmp.ge.s32.totalorder %s26_s27, 2  ;;  %p257_p2 = scmp.lt.s32.totalorder %s1511_s26, 3 }
   0x5   : > { %s2085_s27 = smov (%p27_p1, %s26_s27), 0  ;;  %p258_p3 = pnand %p1368_p0, %p257_p2 }
   0x7   : > { %261 = sbr.rel (%p258_p3) target bundleno = 503 (0x1f7), region = 48 }
   0xe   : > { %v319_v0 = vld [vmem:[%s2059_s1] sm:$0xff]  ;;  %v1513_v2 = vmov 0   ;;  %v320_v3 = vld [vmem:[%s2059_s1 + $0x8] sm:$0xff]  ;;  %v448_v5 = vld [vmem:[%s2062_s4 + $0x10] sm:$0xff]  ;;  %s1369_s9 = sshll.u32 %s1503_s24, 3  ;;  %v332_v22 = vlaneseq  ;;  %vm514_vm0 = vcmask 130048  }
   0xf   : > { %v317_v1 = vld [vmem:[%s2060_s2] sm:$0xff]  ;;  %1420 = vset.pattern.permute.xlu1 %v1513_v2  ;;  %1419 = vset.pattern.permute.xlu0 %v1513_v2  ;;  %v318_v4 = vld [vmem:[%s2060_s2 + $0x8] sm:$0xff]  ;;  %v449_v6 = vld [vmem:[%s2062_s4 + $0x18] sm:$0xff]  ;;  %p299_p4 = scmp.lt.s32.totalorder %s1369_s9, 15  ;;  %vm1219_vm1 = vcmask 1040384   ;;  %vm1228_vm2 = vcmask 1041408  }
  0x10   : > { %323 = vperm.xlu0 %1419, %v319_v0   ;;  %390 = vperm.xlu1 %1420, %v317_v1   ;;  %v450_v7 = vld [vmem:[%s2062_s4 + $0x20] sm:$0xff]  ;;  %v451_v8 = vld [vmem:[%s2062_s4 + $0x28] sm:$0xff]  ;;  %v452_v11 = vld [vmem:[%s2062_s4 + $0x30] sm:$0xff]  ;;  %v333_v23 = vshrl.u32 %v332_v22, 7  ;;  %vm1237_vm3 = vcmask 1042432  }
  0x11   : > { %559 = vmatprep.mubr.bf16.mxu0 %v1513_v2  ;;  %632 = vmatprep.mubr.bf16.mxu1 %v1513_v2  ;;  %v446_v9 = vld [vmem:[%s2062_s4] sm:$0xff]  ;;  %v447_v10 = vld [vmem:[%s2062_s4 + $0x8] sm:$0xff]  ;;  %v453_v12 = vld [vmem:[%s2062_s4 + $0x38] sm:$0xff]  ;;  %s2087_s9 = smov (!%p299_p4, %s1369_s9), 15 }
  0x12   : > { %v819_v13 = vld [vmem:[%s2063_s5] sm:$0xff]  ;;  %v820_v14 = vld [vmem:[%s2063_s5 + $0x8] sm:$0xff]  ;;  %v821_v15 = vld [vmem:[%s2063_s5 + $0x10] sm:$0xff]  ;;  %s303_s12 = scalar_lea.vmem %s2058_s0, %s2087_s9  ;;  %v338_v24 = vsub.s32 1, %v333_v23  ;;  %v346_v25 = vsub.s32 3, %v333_v23  ;;  %v334_v26 = vsub.s32 0, %v333_v23 }
  0x13   : > { %v822_v16 = vld [vmem:[%s2063_s5 + $0x18] sm:$0xff]  ;;  %v823_v17 = vld [vmem:[%s2063_s5 + $0x20] sm:$0xff]  ;;  %v824_v18 = vld [vmem:[%s2063_s5 + $0x28] sm:$0xff]  ;;  %v342_v27 = vsub.s32 2, %v333_v23  ;;  %v354_v29 = vsub.s32 5, %v333_v23  ;;  %v362_v30 = vsub.s32 7, %v333_v23 }
  0x14   : > { %328 = vperm.xlu0 %1419, %v320_v3   ;;  %395 = vperm.xlu1 %1420, %v318_v4   ;;  %v825_v19 = vld [vmem:[%s2063_s5 + $0x30] sm:$0xff]  ;;  %v826_v20 = vld [vmem:[%s2063_s5 + $0x38] sm:$0xff]  ;;  %v1246_v21 = vld [vmem:[%s2064_s6] sm:$0xf]  ;;  %v350_v31 = vsub.s32 4, %v333_v23  ;;  %v358_v32 = vsub.s32 6, %v333_v23 }
  0x15   : > { %v316_v28 = vld [vmem:[%s303_s12] sm:$0xff]  ;;  %s1371_s20 = sshll.u32 %s2087_s9, 2 }
  0x16   : > { %v339_v33 = vrot.slane %v316_v28, %v338_v24  ;;  %v347_v34 = vrot.slane %v316_v28, %v346_v25  ;;  %v335_v35 = vrot.slane %v316_v28, %v334_v26  ;;  %v343_v36 = vrot.slane %v316_v28, %v342_v27  ;;  %s1930_s23 = scalar_lea.vmem %s2065_s7, %s1371_s20 }
  0x17   : > { %v355_v37 = vrot.slane %v316_v28, %v354_v29  ;;  %v363_v38 = vrot.slane %v316_v28, %v362_v30  ;;  %v351_v39 = vrot.slane %v316_v28, %v350_v31  ;;  %v359_v40 = vrot.slane %v316_v28, %v358_v32  ;;  %v1421_v30 = vld [vmem:[%s2061_s3] sm:$0xff]  }
  0x18   : > { %466 = vperm.xlu0 %1419, %v448_v5   ;;  %471 = vperm.xlu1 %1420, %v449_v6  }
  0x1c   : > { %476 = vperm.xlu0 %1419, %v450_v7   ;;  %481 = vperm.xlu1 %1420, %v451_v8  }
  0x20   : > { %456 = vperm.xlu0 %1419, %v446_v9   ;;  %461 = vperm.xlu1 %1420, %v447_v10  }
  0x24   : > { %486 = vperm.xlu0 %1419, %v452_v11   ;;  %491 = vperm.xlu1 %1420, %v453_v12  }
  0x28   : > { %845 = vperm.xlu0 %1419, %v819_v13   ;;  %850 = vperm.xlu1 %1420, %v820_v14  }
  0x2c   : > { %943 = vperm.xlu0 %1419, %v821_v15   ;;  %948 = vperm.xlu1 %1420, %v822_v16  }
  0x30   : > { %1041 = vperm.xlu0 %1419, %v823_v17   ;;  %1046 = vperm.xlu1 %1420, %v824_v18  }
  0x34   : > { %1139 = vperm.xlu0 %1419, %v825_v19   ;;  %1144 = vperm.xlu1 %1420, %v826_v20  }
  0x38   : > { %1249 = vperm.xlu0 %1419, %v1246_v21  }
  0x8f   : > { %v324_v41 = vpop.permute.xlu0 %323  ;;  %v391_v42 = vpop.permute.xlu1 %390 }
  0x90   : > { %v373_v43 = vmul.f32 %v339_v33, %v324_v41  ;;  %v375_v44 = vmul.f32 %v347_v34, %v324_v41  ;;  %v372_v45 = vmul.f32 %v335_v35, %v324_v41  ;;  %v374_v46 = vmul.f32 %v343_v36, %v324_v41 }
  0x91   : > { %v377_v47 = vmul.f32 %v355_v37, %v324_v41  ;;  %v379_v48 = vmul.f32 %v363_v38, %v324_v41  ;;  %v376_v49 = vmul.f32 %v351_v39, %v324_v41  ;;  %v378_v50 = vmul.f32 %v359_v40, %v324_v41  ;;  %v1424_v41 = vld [vmem:[%s2061_s3 + $0x18] sm:$0xff]  }
  0x92   : > { %v399_v51 = vadd.f32 %v391_v42, %v373_v43  ;;  %v401_v52 = vadd.f32 %v391_v42, %v375_v44  ;;  %v398_v53 = vadd.f32 %v391_v42, %v372_v45  ;;  %v400_v54 = vadd.f32 %v391_v42, %v374_v46 }
  0x93   : > { %v329_v55 = vpop.permute.xlu0 %328  ;;  %v403_v56 = vadd.f32 %v391_v42, %v377_v47  ;;  %v405_v57 = vadd.f32 %v391_v42, %v379_v48  ;;  %v402_v58 = vadd.f32 %v391_v42, %v376_v49  ;;  %v404_v62 = vadd.f32 %v391_v42, %v378_v50  ;;  %v396_v63 = vpop.permute.xlu1 %395 }
  0x94   : > { %v381_v59 = vmul.f32 %v339_v33, %v329_v55  ;;  %v415_v60 = vmax.f32 %v399_v51, 0.0  ;;  %v383_v61 = vmul.f32 %v347_v34, %v329_v55  ;;  %v417_v0 = vmax.f32 %v401_v52, 0.0 }
  0x95   : > { %v380_v1 = vmul.f32 %v335_v35, %v329_v55  ;;  %v414_v3 = vmax.f32 %v398_v53, 0.0  ;;  %v382_v4 = vmul.f32 %v343_v36, %v329_v55  ;;  %v416_v7 = vmax.f32 %v400_v54, 0.0 }
  0x96   : > { %v407_v5 = vadd.f32 %v396_v63, %v381_v59  ;;  %v409_v6 = vadd.f32 %v396_v63, %v383_v61  ;;  %v385_v8 = vmul.f32 %v355_v37, %v329_v55  ;;  %v419_v11 = vmax.f32 %v403_v56, 0.0 }
  0x97   : > { %v406_v9 = vadd.f32 %v396_v63, %v380_v1  ;;  %v408_v10 = vadd.f32 %v396_v63, %v382_v4  ;;  %v387_v12 = vmul.f32 %v363_v38, %v329_v55  ;;  %v384_v16 = vmul.f32 %v351_v39, %v329_v55  ;;  %v1422_v39 = vld [vmem:[%s2061_s3 + $0x8] sm:$0xff]   ;;  %v1690_v42 = vpop.permute.xlu0 %466  ;;  %v1692_v43 = vpop.permute.xlu1 %471 }
  0x98   : > { %v423_v13 = vmax.f32 %v407_v5, 0.0  ;;  %v425_v14 = vmax.f32 %v409_v6, 0.0  ;;  %v411_v15 = vadd.f32 %v396_v63, %v385_v8  ;;  %v421_v20 = vmax.f32 %v405_v57, 0.0 }
  0x99   : > { %v422_v17 = vmax.f32 %v406_v9, 0.0  ;;  %v424_v18 = vmax.f32 %v408_v10, 0.0  ;;  %v413_v19 = vadd.f32 %v396_v63, %v387_v12  ;;  %v410_v24 = vadd.f32 %v396_v63, %v384_v16 }
  0x9a   : > { %v439_v21 = vpack.c.bf16 %v423_v13, %v415_v60  ;;  %v441_v22 = vpack.c.bf16 %v425_v14, %v417_v0  ;;  %v427_v23 = vmax.f32 %v411_v15, 0.0  ;;  %v386_v28 = vmul.f32 %v359_v40, %v329_v55  ;;  %v1423_v40 = vld [vmem:[%s2061_s3 + $0x10] sm:$0xff]  }
  0x9b   : > { %v438_v25 = vpack.c.bf16 %v422_v17, %v414_v3  ;;  %v440_v26 = vpack.c.bf16 %v424_v18, %v416_v7  ;;  %v429_v27 = vmax.f32 %v413_v19, 0.0  ;;  %v426_v31 = vmax.f32 %v410_v24, 0.0  ;;  %v1694_v44 = vpop.permute.xlu0 %476  ;;  %v1696_v45 = vpop.permute.xlu1 %481 }
  0x9c   : > { %527 = vmatprep.subr.bf16.mxu0 %v439_v21  ;;  %600 = vmatprep.subr.bf16.mxu1 %v441_v22  ;;  %v443_v29 = vpack.c.bf16 %v427_v23, %v419_v11  ;;  %v418_v33 = vmax.f32 %v402_v58, 0.0  ;;  %v412_v34 = vadd.f32 %v396_v63, %v386_v28  ;;  %v420_v36 = vmax.f32 %v404_v62, 0.0 }
  0x9d   : > { %528 = vmatpush1.bf16.msra.mxu0 %v438_v25  ;;  %601 = vmatpush1.bf16.msra.mxu1 %v440_v26  ;;  %v445_v32 = vpack.c.bf16 %v429_v27, %v421_v20 }
  0x9e   : > { %673 = vmatprep.subr.bf16.mxu0 %v443_v29  ;;  %v442_v35 = vpack.c.bf16 %v426_v31, %v418_v33  ;;  %v428_v37 = vmax.f32 %v412_v34, 0.0 }
  0x9f   : > { %746 = vmatprep.subr.bf16.mxu1 %v445_v32  ;;  %v1698_v46 = vpop.permute.xlu0 %456  ;;  %v1700_v47 = vpop.permute.xlu1 %461 }
  0xa0   : > { %1376 = vmatmul.mubr.msk.bf16.vlgmr.msra.gmra.mrb[0].mxu0 %vm514_vm0, %v1421_v30  ;;  %1380 = vmatmul.mubr.msk.bf16.vlgmr.msra.gmra.mrb[0].mxu1 %vm514_vm0, %v1421_v30  ;;  %v444_v38 = vpack.c.bf16 %v428_v37, %v420_v36 }
  0xa1   : > { %674 = vmatpush1.bf16.msra.mxu0 %v442_v35  ;;  %569 = vmatprep.mubr.bf16.mxu0 %v1513_v2 }
  0xa2   : > { %642 = vmatprep.mubr.bf16.mxu1 %v1513_v2  ;;  %747 = vmatpush1.bf16.msra.mxu1 %v444_v38 }
  0xa3   : > { %v1702_v48 = vpop.permute.xlu0 %486  ;;  %v1704_v49 = vpop.permute.xlu1 %491 }
  0xa7   : > { %v1714_v8 = vpop.permute.xlu0 %845  ;;  %v1716_v9 = vpop.permute.xlu1 %850 }
  0xa8   : > { %1377 = vmatmul.mubr.msk.bf16.gmra.mrb[4].mxu0 %vm514_vm0, %v1422_v39  ;;  %1381 = vmatmul.mubr.msk.bf16.gmra.mrb[4].mxu1 %vm514_vm0, %v1422_v39 }
  0xa9   : > { %579 = vmatprep.mubr.bf16.mxu0 %v1513_v2  ;;  %652 = vmatprep.mubr.bf16.mxu1 %v1513_v2 }
  0xb0   : > { %1378 = vmatmul.mubr.msk.bf16.gmra.mrb[8].mxu0 %vm514_vm0, %v1423_v40  ;;  %1382 = vmatmul.mubr.msk.bf16.gmra.mrb[8].mxu1 %vm514_vm0, %v1423_v40 }
  0xb1   : > { %589 = vmatprep.mubr.bf16.mxu0 %v1513_v2  ;;  %662 = vmatprep.mubr.bf16.mxu1 %v1513_v2 }
  0xb8   : > { %1379 = vmatmul.mubr.msk.bf16.gmra.mrb[12].mxu0 %vm514_vm0, %v1424_v41  ;;  %1383 = vmatmul.mubr.msk.bf16.gmra.mrb[12].mxu1 %vm514_vm0, %v1424_v41 }
  0xb9   : > { %705 = vmatprep.mubr.bf16.mxu0 %v1513_v2  ;;  %778 = vmatprep.mubr.bf16.mxu1 %v1513_v2 }
  0xc0   : > { %1384 = vmatmul.mubr.msk.bf16.vlgmr.msra.gmra.mrb[16].mxu0 %vm514_vm0, %v1421_v30  ;;  %1388 = vmatmul.mubr.msk.bf16.vlgmr.msra.gmra.mrb[16].mxu1 %vm514_vm0, %v1421_v30 }
  0xc1   : > { %715 = vmatprep.mubr.bf16.mxu0 %v1513_v2  ;;  %788 = vmatprep.mubr.bf16.mxu1 %v1513_v2 }
  0xc8   : > { %1385 = vmatmul.mubr.msk.bf16.gmra.mrb[20].mxu0 %vm514_vm0, %v1422_v39  ;;  %1389 = vmatmul.mubr.msk.bf16.gmra.mrb[20].mxu1 %vm514_vm0, %v1422_v39 }
  0xc9   : > { %725 = vmatprep.mubr.bf16.mxu0 %v1513_v2  ;;  %798 = vmatprep.mubr.bf16.mxu1 %v1513_v2 }
  0xd0   : > { %1386 = vmatmul.mubr.msk.bf16.gmra.mrb[24].mxu0 %vm514_vm0, %v1423_v40  ;;  %1390 = vmatmul.mubr.msk.bf16.gmra.mrb[24].mxu1 %vm514_vm0, %v1423_v40 }
  0xd1   : > { %735 = vmatprep.mubr.bf16.mxu0 %v1513_v2  ;;  %808 = vmatprep.mubr.bf16.mxu1 %v1513_v2 }
  0xd8   : > { %1387 = vmatmul.mubr.msk.bf16.gmra.mrb[28].mxu0 %vm514_vm0, %v1424_v41  ;;  %1391 = vmatmul.mubr.msk.bf16.gmra.mrb[28].mxu1 %vm514_vm0, %v1424_v41 }
 0x173   : > { %v561_v2 = vpop.f32.mrb[0].mxu0  ;;  %v634_v50 = vpop.f32.mrb[0].mxu1 }
 0x174   : > { %v562_v51 = vadd.f32 %v561_v2, %v1698_v46  ;;  %v635_v52 = vadd.f32 %v634_v50, %v1698_v46  ;;  %v563_v53 = vpop.f32.mrb[1].mxu0  ;;  %v636_v54 = vpop.f32.mrb[1].mxu1 }
 0x175   : > { %v564_v55 = vadd.f32 %v563_v53, %v1698_v46  ;;  %v637_v56 = vadd.f32 %v636_v54, %v1698_v46  ;;  %v565_v57 = vpop.f32.mrb[2].mxu0  ;;  %v638_v58 = vpop.f32.mrb[2].mxu1 }
 0x176   : > { %v827_v59 = vmax.f32 %v562_v51, 0.0  ;;  %v829_v60 = vmax.f32 %v635_v52, 0.0  ;;  %v566_v61 = vadd.f32 %v565_v57, %v1700_v47  ;;  %v639_v62 = vadd.f32 %v638_v58, %v1700_v47  ;;  %v567_v63 = vpop.f32.mrb[3].mxu0  ;;  %v640_v0 = vpop.f32.mrb[3].mxu1 }
 0x177   : > { %v828_v1 = vmax.f32 %v564_v55, 0.0  ;;  %v830_v3 = vmax.f32 %v637_v56, 0.0  ;;  %v568_v4 = vadd.f32 %v567_v63, %v1700_v47  ;;  %v641_v5 = vadd.f32 %v640_v0, %v1700_v47  ;;  %v1734_v55 = vpop.permute.xlu0 %943 }
 0x178   : > { %v835_v6 = vmax.f32 %v566_v61, 0.0  ;;  %v837_v7 = vmax.f32 %v639_v62, 0.0  ;;  %v853_v12 = vmul.f32 %v1714_v8, %v827_v59  ;;  %v855_v13 = vmul.f32 %v1714_v8, %v829_v60 }
 0x179   : > { %v836_v10 = vmax.f32 %v568_v4, 0.0  ;;  %v838_v11 = vmax.f32 %v641_v5, 0.0  ;;  %v854_v16 = vmul.f32 %v1714_v8, %v828_v1  ;;  %v856_v17 = vmul.f32 %v1714_v8, %v830_v3 }
 0x17a   : > { %v861_v14 = vmul.f32 %v1716_v9, %v835_v6  ;;  %v863_v15 = vmul.f32 %v1716_v9, %v837_v7 }
 0x17b   : > { %v862_v18 = vmul.f32 %v1716_v9, %v836_v10  ;;  %v864_v19 = vmul.f32 %v1716_v9, %v838_v11  ;;  %v571_v20 = vpop.f32.mrb[4].mxu0  ;;  %v644_v21 = vpop.f32.mrb[4].mxu1 }
 0x17c   : > { %v869_v22 = vadd.f32 %v861_v14, %v853_v12  ;;  %v883_v23 = vadd.f32 %v863_v15, %v855_v13  ;;  %v572_v24 = vadd.f32 %v571_v20, %v1690_v42  ;;  %v645_v25 = vadd.f32 %v644_v21, %v1690_v42  ;;  %v573_v26 = vpop.f32.mrb[5].mxu0  ;;  %v646_v27 = vpop.f32.mrb[5].mxu1 }
 0x17d   : > { %v876_v28 = vadd.f32 %v862_v18, %v854_v16  ;;  %v890_v29 = vadd.f32 %v864_v19, %v856_v17  ;;  %v574_v30 = vadd.f32 %v573_v26, %v1690_v42  ;;  %v647_v31 = vadd.f32 %v646_v27, %v1690_v42  ;;  %v575_v32 = vpop.f32.mrb[6].mxu0  ;;  %v648_v33 = vpop.f32.mrb[6].mxu1 }
 0x17e   : > { %v870_v34 = vrot.slane %v869_v22, 4  ;;  %v884_v35 = vrot.slane %v883_v23, 4  ;;  %1425 = vtanh.f32 %v572_v24  ;;  %v576_v36 = vadd.f32 %v575_v32, %v1692_v43  ;;  %v577_v37 = vpop.f32.mrb[7].mxu0  ;;  %v650_v38 = vpop.f32.mrb[7].mxu1 }
 0x17f   : > { %v877_v39 = vrot.slane %v876_v28, 4  ;;  %v891_v40 = vrot.slane %v890_v29, 4  ;;  %1427 = vtanh.f32 %v645_v25  ;;  %v649_v41 = vadd.f32 %v648_v33, %v1692_v43  ;;  %v1749_v27 = vpop.permute.xlu1 %948 }
 0x180   : > { %v871_v2 = vadd.f32 %v870_v34, %v869_v22  ;;  %v885_v50 = vadd.f32 %v884_v35, %v883_v23  ;;  %1429 = vtanh.f32 %v574_v30  ;;  %v578_v51 = vadd.f32 %v577_v37, %v1692_v43  ;;  %v1741_v22 = vpop.permute.xlu0 %1041  ;;  %2075 = vst [vmem:[#allocation3_spill] sm:$0xff] %v1749_v27 }
 0x181   : > { %v878_v52 = vadd.f32 %v877_v39, %v876_v28  ;;  %v892_v53 = vadd.f32 %v891_v40, %v890_v29  ;;  %1431 = vtanh.f32 %v647_v31  ;;  %v651_v54 = vadd.f32 %v650_v38, %v1692_v43  ;;  %2074 = vst [vmem:[#allocation2_spill] sm:$0xff] %v1741_v22 }
 0x182   : > { %v872_v56 = vrot.slane %v871_v2, 2  ;;  %v886_v57 = vrot.slane %v885_v50, 2  ;;  %1433 = vtanh.f32 %v576_v36 }
 0x183   : > { %v879_v58 = vrot.slane %v878_v52, 2  ;;  %v893_v59 = vrot.slane %v892_v53, 2  ;;  %1435 = vtanh.f32 %v649_v41  ;;  %v581_v60 = vpop.f32.mrb[8].mxu0  ;;  %v654_v61 = vpop.f32.mrb[8].mxu1 }
 0x184   : > { %v873_v62 = vadd.f32 %v872_v56, %v871_v2  ;;  %v887_v63 = vadd.f32 %v886_v57, %v885_v50  ;;  %1437 = vtanh.f32 %v578_v51  ;;  %v582_v0 = vadd.f32 %v581_v60, %v1694_v44  ;;  %v583_v1 = vpop.f32.mrb[9].mxu0  ;;  %v656_v3 = vpop.f32.mrb[9].mxu1 }
 0x185   : > { %v880_v4 = vadd.f32 %v879_v58, %v878_v52  ;;  %v894_v5 = vadd.f32 %v893_v59, %v892_v53  ;;  %1439 = vtanh.f32 %v651_v54  ;;  %v655_v6 = vadd.f32 %v654_v61, %v1694_v44  ;;  %v585_v7 = vpop.f32.mrb[10].mxu0  ;;  %v658_v10 = vpop.f32.mrb[10].mxu1 }
 0x186   : > { %v874_v11 = vrot.slane %v873_v62, 1  ;;  %v888_v12 = vrot.slane %v887_v63, 1  ;;  %1441 = vtanh.f32 %v582_v0  ;;  %v584_v13 = vadd.f32 %v583_v1, %v1694_v44  ;;  %v587_v14 = vpop.f32.mrb[11].mxu0  ;;  %v660_v15 = vpop.f32.mrb[11].mxu1 }
 0x187   : > { %v881_v16 = vrot.slane %v880_v4, 1  ;;  %v895_v17 = vrot.slane %v894_v5, 1  ;;  %1443 = vtanh.f32 %v655_v6  ;;  %v657_v18 = vadd.f32 %v656_v3, %v1694_v44  ;;  %v1768_v1 = vpop.permute.xlu0 %1139 }
 0x188   : > { %v1426_v19 = vpop.eup %1425  ;;  %1445 = vtanh.f32 %v584_v13  ;;  %v586_v20 = vadd.f32 %v585_v7, %v1696_v45  ;;  %v1743_v23 = vadd.f32 %v874_v11, %v873_v62  ;;  %v1745_v24 = vadd.f32 %v888_v12, %v887_v63  ;;  %2076 = vst [vmem:[#allocation4_spill] sm:$0xff] %v1768_v1 }
 0x189   : > { %v1428_v21 = vpop.eup %1427  ;;  %v1747_v25 = vadd.f32 %v881_v16, %v880_v4  ;;  %1447 = vtanh.f32 %v657_v18  ;;  %v1751_v28 = vadd.f32 %v895_v17, %v894_v5  ;;  %v659_v29 = vadd.f32 %v658_v10, %v1696_v45 }
 0x18a   : > { %v1430_v26 = vpop.eup %1429  ;;  %1449 = vtanh.f32 %v586_v20  ;;  %v588_v30 = vadd.f32 %v587_v14, %v1696_v45  ;;  %v951_v32 = vmul.f32 %v1426_v19, %v1734_v55  ;;  %v953_v33 = vmul.f32 %v1428_v21, %v1734_v55 }
 0x18b   : > { %v1432_v31 = vpop.eup %1431  ;;  %v952_v34 = vmul.f32 %v1430_v26, %v1734_v55  ;;  %v661_v35 = vadd.f32 %v660_v15, %v1696_v45  ;;  %v591_v36 = vpop.f32.mrb[12].mxu0  ;;  %1451 = vtanh.f32 %v659_v29 }
 0x18c   : > { %v664_v37 = vpop.f32.mrb[12].mxu1  ;;  %v1434_v38 = vpop.eup %1433  ;;  %v954_v39 = vmul.f32 %v1432_v31, %v1734_v55  ;;  %v592_v40 = vadd.f32 %v591_v36, %v1702_v48  ;;  %1453 = vtanh.f32 %v588_v30 }
 0x18d   : > { %v665_v41 = vadd.f32 %v664_v37, %v1702_v48  ;;  %v593_v2 = vpop.f32.mrb[13].mxu0  ;;  %v666_v50 = vpop.f32.mrb[13].mxu1  ;;  %v959_v52 = vmul.f32 %v1434_v38, %v1749_v27  ;;  %1455 = vtanh.f32 %v661_v35 }
 0x18e   : > { %v1436_v51 = vpop.eup %1435  ;;  %v594_v53 = vadd.f32 %v593_v2, %v1702_v48  ;;  %v667_v54 = vadd.f32 %v666_v50, %v1702_v48  ;;  %v595_v56 = vpop.f32.mrb[14].mxu0  ;;  %v1121_v60 = vmax.f32 %v592_v40, 0.0 }
 0x18f   : > { %v668_v57 = vpop.f32.mrb[14].mxu1  ;;  %v1438_v58 = vpop.eup %1437  ;;  %v961_v59 = vmul.f32 %v1436_v51, %v1749_v27  ;;  %v1123_v61 = vmax.f32 %v665_v41, 0.0  ;;  %v967_v3 = vadd.f32 %v959_v52, %v951_v32 }
 0x190   : > { %v597_v62 = vpop.f32.mrb[15].mxu0  ;;  %v1766_v63 = vpop.f32.mrb[15].mxu1  ;;  %v960_v4 = vmul.f32 %v1438_v58, %v1749_v27  ;;  %v1122_v5 = vmax.f32 %v594_v53, 0.0  ;;  %v1124_v6 = vmax.f32 %v667_v54, 0.0  ;;  %v1773_v12 = vmul.f32 %v1768_v1, %v1121_v60 }
 0x191   : > { %v1440_v0 = vpop.eup %1439  ;;  %v981_v10 = vadd.f32 %v961_v59, %v953_v33  ;;  %v1776_v13 = vmul.f32 %v1768_v1, %v1123_v61  ;;  %v1778_v15 = vpop.permute.xlu1 %1046  ;;  %v968_v16 = vrot.slane %v967_v3, 4  ;;  %v1796_v2 = vadd.f32 %v668_v57, %v1704_v49 }
 0x192   : > { %v1442_v7 = vpop.eup %1441  ;;  %v962_v11 = vmul.f32 %v1440_v0, %v1749_v27  ;;  %2077 = vst [vmem:[#allocation5_spill] sm:$0xff] %v1778_v15  ;;  %v974_v17 = vadd.f32 %v960_v4, %v952_v34  ;;  %v1782_v19 = vmul.f32 %v1768_v1, %v1122_v5  ;;  %v1786_v30 = vmul.f32 %v1768_v1, %v1124_v6 }
 0x193   : > { %v1444_v14 = vpop.eup %1443  ;;  %v1049_v18 = vmul.f32 %v1442_v7, %v1741_v22  ;;  %v982_v21 = vrot.slane %v981_v10, 4  ;;  %v969_v32 = vadd.f32 %v968_v16, %v967_v3  ;;  %v596_v34 = vadd.f32 %v595_v56, %v1704_v49  ;;  %v1790_v36 = vpop.f32.mrb[16].mxu0 }
 0x194   : > { %v1446_v20 = vpop.eup %1445  ;;  %v988_v26 = vadd.f32 %v962_v11, %v954_v39  ;;  %v1051_v29 = vmul.f32 %v1444_v14, %v1741_v22  ;;  %v975_v33 = vrot.slane %v974_v17, 4  ;;  %v1792_v37 = vpop.f32.mrb[16].mxu1  ;;  %v1131_v3 = vmax.f32 %v1796_v2, 0.0 }
 0x195   : > { %v1448_v31 = vpop.eup %1447  ;;  %v1050_v35 = vmul.f32 %v1446_v20, %v1741_v22  ;;  %v983_v40 = vadd.f32 %v982_v21, %v981_v10  ;;  %v1798_v50 = vpop.f32.mrb[17].mxu0  ;;  %v970_v52 = vrot.slane %v969_v32, 2  ;;  %v1129_v56 = vmax.f32 %v596_v34, 0.0 }
 0x196   : > { %v1450_v38 = vpop.eup %1449  ;;  %v989_v39 = vrot.slane %v988_v26, 4  ;;  %v1052_v41 = vmul.f32 %v1448_v31, %v1741_v22  ;;  %v1800_v51 = vpop.f32.mrb[17].mxu1  ;;  %v976_v53 = vadd.f32 %v975_v33, %v974_v17  ;;  %v1809_v57 = vadd.f32 %v597_v62, %v1704_v49 }
 0x197   : > { %v1057_v54 = vmul.f32 %v1450_v38, %v1778_v15  ;;  %v1803_v58 = vpop.f32.mrb[18].mxu0  ;;  %v1805_v59 = vpop.f32.mrb[18].mxu1  ;;  %v984_v61 = vrot.slane %v983_v40, 2  ;;  %v971_v10 = vadd.f32 %v970_v52, %v969_v32 }
 0x198   : > { %v1452_v60 = vpop.eup %1451  ;;  %v990_v0 = vadd.f32 %v989_v39, %v988_v26  ;;  %v1811_v4 = vpop.f32.mrb[19].mxu0  ;;  %v977_v11 = vrot.slane %v976_v53, 2 }
 0x199   : > { %v1813_v5 = vpop.f32.mrb[19].mxu1  ;;  %v1454_v6 = vpop.eup %1453  ;;  %v1065_v14 = vadd.f32 %v1057_v54, %v1049_v18  ;;  %v1059_v16 = vmul.f32 %v1452_v60, %v1778_v15  ;;  %v985_v20 = vadd.f32 %v984_v61, %v983_v40  ;;  %v972_v31 = vrot.slane %v971_v10, 1 }
 0x19a   : > { %v1815_v7 = vpop.permute.xlu1 %1144  ;;  %v1456_v17 = vpop.eup %1455  ;;  %v991_v21 = vrot.slane %v990_v0, 2  ;;  %v1058_v26 = vmul.f32 %v1454_v6, %v1778_v15  ;;  %v978_v33 = vadd.f32 %v977_v11, %v976_v53 }
 0x19b   : > { %v1155_v62 = vmul.f32 %v1815_v7, %v1129_v56  ;;  %v1066_v34 = vrot.slane %v1065_v14, 4  ;;  %v1079_v38 = vadd.f32 %v1059_v16, %v1051_v29  ;;  %v986_v39 = vrot.slane %v985_v20, 1  ;;  %v1821_v40 = vpop.f32.mrb[20].mxu0  ;;  %v1823_v61 = vpop.f32.mrb[20].mxu1 }
 0x19c   : > { %v992_v2 = vadd.f32 %v991_v21, %v990_v0  ;;  %v1072_v22 = vadd.f32 %v1058_v26, %v1050_v35  ;;  %v1060_v32 = vmul.f32 %v1456_v17, %v1778_v15  ;;  %v973_v18 = vadd.f32 %v972_v31, %v971_v10  ;;  %v1825_v11 = vpop.f32.mrb[21].mxu0  ;;  %v1827_v29 = vpop.f32.mrb[21].mxu1 }
 0x19d   : > { %v979_v52 = vrot.slane %v978_v33, 1  ;;  %v1067_v54 = vadd.f32 %v1066_v34, %v1065_v14  ;;  %v1080_v60 = vrot.slane %v1079_v38, 4  ;;  %v987_v6 = vadd.f32 %v986_v39, %v985_v20  ;;  %v1830_v17 = vpop.f32.mrb[22].mxu0  ;;  %v1832_v14 = vpop.f32.mrb[22].mxu1 }
 0x19e   : > { %v993_v56 = vrot.slane %v992_v2, 1  ;;  %v1073_v1 = vrot.slane %v1072_v22, 4  ;;  %v1086_v53 = vadd.f32 %v1060_v32, %v1052_v41  ;;  %v1163_v10 = vadd.f32 %v1155_v62, %v1773_v12  ;;  %v1836_v41 = vpop.f32.mrb[23].mxu0  ;;  %v1838_v34 = vpop.f32.mrb[23].mxu1 }
 0x19f   : > { %v980_v35 = vadd.f32 %v979_v52, %v978_v33  ;;  %v1068_v0 = vrot.slane %v1067_v54, 2  ;;  %v1081_v16 = vadd.f32 %v1080_v60, %v1079_v38  ;;  %v1220_v20 = vsel %vm1219_vm1, %v1743_v23, %v973_v18 }
 0x1a0   : > { %v994_v21 = vadd.f32 %v993_v56, %v992_v2  ;;  %v1074_v26 = vadd.f32 %v1073_v1, %v1072_v22  ;;  %v1087_v31 = vrot.slane %v1086_v53, 4  ;;  %v1164_v32 = vrot.slane %v1163_v10, 4 }
 0x1a1   : > { %v1069_v39 = vadd.f32 %v1068_v0, %v1067_v54  ;;  %v1082_v33 = vrot.slane %v1081_v16, 2  ;;  %v1157_v38 = vmul.f32 %v1815_v7, %v1131_v3  ;;  %v1222_v2 = vsel %vm1219_vm1, %v1745_v24, %v987_v6 }
 0x1a2   : > { %v1075_v12 = vrot.slane %v1074_v26, 2  ;;  %v1088_v62 = vadd.f32 %v1087_v31, %v1086_v53  ;;  %v1130_v22 = vmax.f32 %v1809_v57, 0.0  ;;  %v1165_v23 = vadd.f32 %v1164_v32, %v1163_v10 }
 0x1a3   : > { %v1070_v1 = vrot.slane %v1069_v39, 1  ;;  %v1083_v52 = vadd.f32 %v1082_v33, %v1081_v16  ;;  %v1177_v18 = vadd.f32 %v1157_v38, %v1776_v13  ;;  %v1221_v3 = vsel %vm1219_vm1, %v1747_v25, %v980_v35  ;;  %v1848_v27 = vpop.f32.mrb[24].mxu0  ;;  %v1850_v24 = vpop.f32.mrb[24].mxu1 }
 0x1a4   : > { %v1076_v60 = vadd.f32 %v1075_v12, %v1074_v26  ;;  %v1089_v56 = vrot.slane %v1088_v62, 2  ;;  %v1156_v54 = vmul.f32 %v1815_v7, %v1130_v22  ;;  %v1166_v31 = vrot.slane %v1165_v23, 2  ;;  %v1855_v10 = vpop.f32.mrb[25].mxu0  ;;  %v1857_v26 = vpop.f32.mrb[25].mxu1 }
 0x1a5   : > { %v1071_v0 = vadd.f32 %v1070_v1, %v1069_v39  ;;  %v1084_v53 = vrot.slane %v1083_v52, 1  ;;  %v1178_v15 = vrot.slane %v1177_v18, 4  ;;  %v671_v13 = vadd.f32 %v1766_v63, %v1704_v49  ;;  %v1860_v32 = vpop.f32.mrb[26].mxu0  ;;  %v1862_v38 = vpop.f32.mrb[26].mxu1 }
 0x1a6   : > { %v1077_v57 = vrot.slane %v1076_v60, 1  ;;  %v1090_v6 = vadd.f32 %v1089_v56, %v1088_v62  ;;  %v1170_v16 = vadd.f32 %v1156_v54, %v1782_v19  ;;  %v1167_v35 = vadd.f32 %v1166_v31, %v1165_v23  ;;  %v1864_v1 = vpop.f32.mrb[27].mxu0  ;;  %v1866_v63 = vpop.f32.mrb[27].mxu1 }
 0x1a7   : > { %v1085_v25 = vadd.f32 %v1084_v53, %v1083_v52  ;;  %v1229_v39 = vsel %vm1228_vm2, %v1220_v20, %v1071_v0  ;;  %v1179_v33 = vadd.f32 %v1178_v15, %v1177_v18  ;;  %v1132_v19 = vmax.f32 %v671_v13, 0.0  ;;  %v1877_v13 = vpop.permute.xlu0 %1249 }
 0x1a8   : > { %v1078_v12 = vadd.f32 %v1077_v57, %v1076_v60  ;;  %v1091_v62 = vrot.slane %v1090_v6, 1  ;;  %v1171_v22 = vrot.slane %v1170_v16, 4  ;;  %v1168_v56 = vrot.slane %v1167_v35, 1 }
 0x1a9   : > { %v1180_v54 = vrot.slane %v1179_v33, 2  ;;  %v1231_v52 = vsel %vm1228_vm2, %v1222_v2, %v1085_v25  ;;  %v1223_v20 = vsel %vm1219_vm1, %v1751_v28, %v994_v21  ;;  %v1158_v60 = vmul.f32 %v1815_v7, %v1132_v19 }
 0x1aa   : > { %v1092_v15 = vadd.f32 %v1091_v62, %v1090_v6  ;;  %v1172_v23 = vadd.f32 %v1171_v22, %v1170_v16  ;;  %v1230_v18 = vsel %vm1228_vm2, %v1221_v3, %v1078_v12  ;;  %v1169_v0 = vadd.f32 %v1168_v56, %v1167_v35 }
 0x1ab   : > { %v1181_v53 = vadd.f32 %v1180_v54, %v1179_v33  ;;  %v708_v31 = vadd.f32 %v1790_v36, %v1698_v46  ;;  %v781_v57 = vadd.f32 %v1792_v37, %v1698_v46  ;;  %v1184_v25 = vadd.f32 %v1158_v60, %v1786_v30  ;;  %v1886_v36 = vpop.f32.mrb[28].mxu0  ;;  %v1888_v33 = vpop.f32.mrb[28].mxu1 }
 0x1ac   : > { %v1173_v2 = vrot.slane %v1172_v23, 2  ;;  %v1881_v28 = vsel %vm1228_vm2, %v1223_v20, %v1092_v15  ;;  %v710_v21 = vadd.f32 %v1798_v50, %v1698_v46  ;;  %v1238_v3 = vsel %vm1237_vm3, %v1229_v39, %v1169_v0  ;;  %v1891_v22 = vpop.f32.mrb[29].mxu0  ;;  %v1893_v19 = vpop.f32.mrb[29].mxu1 }
 0x1ad   : > { %v1182_v6 = vrot.slane %v1181_v53, 1  ;;  %v831_v16 = vmax.f32 %v708_v31, 0.0  ;;  %v833_v35 = vmax.f32 %v781_v57, 0.0  ;;  %v1252_v37 = vadd.f32 %v1877_v13, %v1238_v3  ;;  %v1899_v20 = vpop.f32.mrb[30].mxu0  ;;  %v1901_v15 = vpop.f32.mrb[30].mxu1 }
 0x1ae   : > { %v1174_v12 = vadd.f32 %v1173_v2, %v1172_v23  ;;  %v1185_v62 = vrot.slane %v1184_v25, 4  ;;  %v832_v30 = vmax.f32 %v710_v21, 0.0  ;;  %v783_v54 = vadd.f32 %v1800_v51, %v1698_v46  ;;  %v1908_v57 = vpop.f32.mrb[31].mxu1 }
 0x1af   : > { %v1183_v56 = vadd.f32 %v1182_v6, %v1181_v53  ;;  %v857_v50 = vmul.f32 %v1714_v8, %v831_v16  ;;  %v859_v39 = vmul.f32 %v1714_v8, %v833_v35  ;;  %v712_v31 = vadd.f32 %v1803_v58, %v1700_v47  ;;  %v1906_v53 = vpop.f32.mrb[31].mxu0 }
 0x1b0   : > { %v1175_v23 = vrot.slane %v1174_v12, 1  ;;  %v1186_v60 = vadd.f32 %v1185_v62, %v1184_v25  ;;  %v858_v0 = vmul.f32 %v1714_v8, %v832_v30  ;;  %v834_v21 = vmax.f32 %v783_v54, 0.0 }
 0x1b1   : > { %v1240_v2 = vsel %vm1237_vm3, %v1231_v52, %v1183_v56  ;;  %v785_v46 = vadd.f32 %v1805_v59, %v1700_v47  ;;  %v714_v51 = vadd.f32 %v1811_v4, %v1700_v47  ;;  %v839_v16 = vmax.f32 %v712_v31, 0.0 }
 0x1b2   : > { %v1254_v25 = vadd.f32 %v1877_v13, %v1240_v2  ;;  %v1176_v3 = vadd.f32 %v1175_v23, %v1174_v12  ;;  %v1187_v6 = vrot.slane %v1186_v60, 2  ;;  %v860_v58 = vmul.f32 %v1714_v8, %v834_v21 }
 0x1b3   : > { %v841_v35 = vmax.f32 %v785_v46, 0.0  ;;  %v840_v62 = vmax.f32 %v714_v51, 0.0  ;;  %v787_v52 = vadd.f32 %v1813_v5, %v1700_v47  ;;  %v865_v59 = vmul.f32 %v1716_v9, %v839_v16 }
 0x1b4   : > { %v1239_v30 = vsel %vm1237_vm3, %v1230_v18, %v1176_v3  ;;  %v1188_v56 = vadd.f32 %v1187_v6, %v1186_v60  ;;  %v718_v4 = vadd.f32 %v1821_v40, %v1690_v42  ;;  %v791_v18 = vadd.f32 %v1823_v61, %v1690_v42 }
 0x1b5   : > { %v1253_v12 = vadd.f32 %v1877_v13, %v1239_v30  ;;  %v867_v54 = vmul.f32 %v1716_v9, %v841_v35  ;;  %v866_v23 = vmul.f32 %v1716_v9, %v840_v62  ;;  %v842_v8 = vmax.f32 %v787_v52, 0.0 }
 0x1b6   : > { %v1189_v47 = vrot.slane %v1188_v56, 1  ;;  %v897_v5 = vadd.f32 %v865_v59, %v857_v50  ;;  %1457 = vtanh.f32 %v718_v4  ;;  %v720_v51 = vadd.f32 %v1825_v11, %v1690_v42 }
 0x1b7   : > { %v1268_v40 = vcombine.low %v1252_v37, %v1253_v12  ;;  %v911_v60 = vadd.f32 %v867_v54, %v859_v39  ;;  %v904_v31 = vadd.f32 %v866_v23, %v858_v0  ;;  %v868_v2 = vmul.f32 %v1716_v9, %v842_v8 }
 0x1b8   : > { %v1190_v21 = vadd.f32 %v1189_v47, %v1188_v56  ;;  %v898_v46 = vrot.slane %v897_v5, 4  ;;  %1459 = vtanh.f32 %v791_v18  ;;  %v793_v50 = vadd.f32 %v1827_v29, %v1690_v42 }
 0x1b9   : > { %1276 = vst [vmem:[%s1930_s23] sm:$0xff] %v1268_v40  ;;  %v912_v3 = vrot.slane %v911_v60, 4  ;;  %v905_v6 = vrot.slane %v904_v31, 4  ;;  %v918_v16 = vadd.f32 %v868_v2, %v860_v58  ;;  %1461 = vtanh.f32 %v720_v51 }
 0x1ba   : > { %v1241_v61 = vsel %vm1237_vm3, %v1881_v28, %v1190_v21  ;;  %v899_v37 = vadd.f32 %v898_v46, %v897_v5  ;;  %v722_v9 = vadd.f32 %v1830_v17, %v1692_v43  ;;  %1463 = vtanh.f32 %v793_v50 }
 0x1bb   : > { %v1255_v39 = vadd.f32 %v1877_v13, %v1241_v61  ;;  %v913_v0 = vadd.f32 %v912_v3, %v911_v60  ;;  %v906_v11 = vadd.f32 %v905_v6, %v904_v31  ;;  %v919_v35 = vrot.slane %v918_v16, 4 }
 0x1bc   : > { %v900_v62 = vrot.slane %v899_v37, 2  ;;  %v795_v58 = vadd.f32 %v1832_v14, %v1692_v43  ;;  %v724_v42 = vadd.f32 %v1836_v41, %v1692_v43  ;;  %1465 = vtanh.f32 %v722_v9 }
 0x1bd   : > { %v1269_v29 = vcombine.low %v1254_v25, %v1255_v39  ;;  %v914_v28 = vrot.slane %v913_v0, 2  ;;  %v907_v52 = vrot.slane %v906_v11, 2  ;;  %v920_v30 = vadd.f32 %v919_v35, %v918_v16 }
 0x1be   : > { %v901_v56 = vadd.f32 %v900_v62, %v899_v37  ;;  %v797_v17 = vadd.f32 %v1838_v34, %v1692_v43  ;;  %1467 = vtanh.f32 %v795_v58  ;;  %v728_v14 = vadd.f32 %v1848_v27, %v1694_v44  ;;  %v2078_v37 = vld [vmem:[#allocation3_spill] sm:$0xff] }
 0x1bf   : > { %1277 = vst [vmem:[%s1930_s23 + $0x8] sm:$0xff] %v1269_v29  ;;  %v915_v59 = vadd.f32 %v914_v28, %v913_v0  ;;  %v908_v4 = vadd.f32 %v907_v52, %v906_v11  ;;  %v921_v12 = vrot.slane %v920_v30, 2  ;;  %1469 = vtanh.f32 %v724_v42  ;;  %v2079_v0 = vld [vmem:[#allocation4_spill] sm:$0xff] }
 0x1c0   : > { %v1458_v54 = vpop.eup %1457  ;;  %v902_v23 = vrot.slane %v901_v56, 1  ;;  %v801_v41 = vadd.f32 %v1850_v24, %v1694_v44  ;;  %v730_v43 = vadd.f32 %v1855_v10, %v1694_v44  ;;  %1471 = vtanh.f32 %v797_v17 }
 0x1c1   : > { %v916_v25 = vrot.slane %v915_v59, 1  ;;  %v909_v8 = vrot.slane %v908_v4, 1  ;;  %v922_v47 = vadd.f32 %v921_v12, %v920_v30  ;;  %v955_v18 = vmul.f32 %v1458_v54, %v1734_v55 }
 0x1c2   : > { %v1460_v34 = vpop.eup %1459  ;;  %v1958_v5 = vadd.f32 %v902_v23, %v901_v56  ;;  %v803_v40 = vadd.f32 %v1857_v26, %v1694_v44  ;;  %v732_v31 = vadd.f32 %v1860_v32, %v1696_v45  ;;  %1473 = vtanh.f32 %v728_v14 }
 0x1c3   : > { %v1963_v60 = vadd.f32 %v916_v25, %v915_v59  ;;  %v923_v27 = vrot.slane %v922_v47, 1  ;;  %v957_v24 = vmul.f32 %v1460_v34, %v1734_v55  ;;  %v1462_v2 = vpop.eup %1461  ;;  %v1968_v21 = vadd.f32 %v909_v8, %v908_v4 }
 0x1c4   : > { %v805_v10 = vadd.f32 %v1862_v38, %v1696_v45  ;;  %v734_v46 = vadd.f32 %v1864_v1, %v1696_v45  ;;  %1475 = vtanh.f32 %v801_v41  ;;  %v807_v44 = vadd.f32 %v1866_v63, %v1696_v45  ;;  %v1464_v32 = vpop.eup %1463 }
 0x1c5   : > { %v1974_v51 = vadd.f32 %v923_v27, %v922_v47  ;;  %v738_v26 = vadd.f32 %v1886_v36, %v1702_v48  ;;  %1477 = vtanh.f32 %v730_v43  ;;  %v811_v3 = vadd.f32 %v1888_v33, %v1702_v48  ;;  %v2080_v47 = vld [vmem:[#allocation2_spill] sm:$0xff] }
 0x1c6   : > { %v740_v38 = vadd.f32 %v1891_v22, %v1702_v48  ;;  %v813_v1 = vadd.f32 %v1893_v19, %v1702_v48  ;;  %v958_v6 = vmul.f32 %v1464_v32, %v1734_v55  ;;  %1479 = vtanh.f32 %v803_v40  ;;  %v1466_v63 = vpop.eup %1465 }
 0x1c7   : > { %v1125_v16 = vmax.f32 %v738_v26, 0.0  ;;  %v742_v45 = vadd.f32 %v1899_v20, %v1704_v49  ;;  %v956_v36 = vmul.f32 %v1462_v2, %v1734_v55  ;;  %1481 = vtanh.f32 %v732_v31 }
 0x1c8   : > { %v1127_v50 = vmax.f32 %v811_v3, 0.0  ;;  %v1126_v61 = vmax.f32 %v740_v38, 0.0  ;;  %v1468_v33 = vpop.eup %1467  ;;  %v963_v9 = vmul.f32 %v1466_v63, %v2078_v37  ;;  %1483 = vtanh.f32 %v805_v10  ;;  %v2081_v63 = vld [vmem:[#allocation5_spill] sm:$0xff] }
 0x1c9   : > { %v1128_v22 = vmax.f32 %v813_v1, 0.0  ;;  %v1133_v39 = vmax.f32 %v742_v45, 0.0  ;;  %v1470_v48 = vpop.eup %1469  ;;  %v965_v19 = vmul.f32 %v1468_v33, %v2078_v37  ;;  %1485 = vtanh.f32 %v734_v46 }
 0x1ca   : > { %v1151_v11 = vmul.f32 %v2079_v0, %v1125_v16  ;;  %v1153_v20 = vmul.f32 %v2079_v0, %v1127_v50  ;;  %v995_v35 = vadd.f32 %v963_v9, %v955_v18  ;;  %v964_v55 = vmul.f32 %v1470_v48, %v2078_v37  ;;  %v1472_v58 = vpop.eup %1471 }
 0x1cb   : > { %1487 = vtanh.f32 %v807_v44  ;;  %v1996_v62 = vmul.f32 %v2079_v0, %v1126_v61  ;;  %v1009_v42 = vadd.f32 %v965_v19, %v957_v24  ;;  %v1159_v29 = vmul.f32 %v1815_v7, %v1133_v39 }
 0x1cc   : > { %v815_v28 = vadd.f32 %v1901_v15, %v1704_v49  ;;  %v2003_v52 = vadd.f32 %v1906_v53, %v1704_v49  ;;  %v996_v30 = vrot.slane %v995_v35, 4  ;;  %v1002_v56 = vadd.f32 %v964_v55, %v956_v36  ;;  %v1474_v4 = vpop.eup %1473 }
 0x1cd   : > { %v966_v17 = vmul.f32 %v1472_v58, %v2078_v37  ;;  %v2007_v59 = vmul.f32 %v2079_v0, %v1128_v22  ;;  %v1010_v12 = vrot.slane %v1009_v42, 4  ;;  %v1191_v54 = vadd.f32 %v1159_v29, %v1151_v11 }
 0x1ce   : > { %v1135_v23 = vmax.f32 %v815_v28, 0.0  ;;  %v1134_v14 = vmax.f32 %v2003_v52, 0.0  ;;  %v1476_v41 = vpop.eup %1475  ;;  %v997_v25 = vadd.f32 %v996_v30, %v995_v35  ;;  %v1003_v15 = vrot.slane %v1002_v56, 4 }
 0x1cf   : > { %v1016_v8 = vadd.f32 %v966_v17, %v958_v6  ;;  %v1053_v53 = vmul.f32 %v1474_v4, %v2080_v47  ;;  %v1478_v43 = vpop.eup %1477  ;;  %v1011_v34 = vadd.f32 %v1010_v12, %v1009_v42  ;;  %v1055_v18 = vmul.f32 %v1476_v41, %v2080_v47 }
 0x1d0   : > { %v1192_v40 = vrot.slane %v1191_v54, 4  ;;  %v1161_v27 = vmul.f32 %v1815_v7, %v1135_v23  ;;  %v1480_v24 = vpop.eup %1479  ;;  %v998_v31 = vrot.slane %v997_v25, 2  ;;  %v1004_v2 = vadd.f32 %v1003_v15, %v1002_v56 }
 0x1d1   : > { %v1017_v10 = vrot.slane %v1016_v8, 4  ;;  %v1054_v46 = vmul.f32 %v1478_v43, %v2080_v47  ;;  %v1482_v44 = vpop.eup %1481  ;;  %v1012_v26 = vrot.slane %v1011_v34, 2  ;;  %v1056_v32 = vmul.f32 %v1480_v24, %v2080_v47 }
 0x1d2   : > { %v1193_v3 = vadd.f32 %v1192_v40, %v1191_v54  ;;  %v1205_v38 = vadd.f32 %v1161_v27, %v1153_v20  ;;  %v1484_v1 = vpop.eup %1483  ;;  %v999_v6 = vadd.f32 %v998_v31, %v997_v25  ;;  %v1005_v16 = vrot.slane %v1004_v2, 2 }
 0x1d3   : > { %v1018_v45 = vadd.f32 %v1017_v10, %v1016_v8  ;;  %v1061_v36 = vmul.f32 %v1482_v44, %v2081_v63  ;;  %v1486_v50 = vpop.eup %1485  ;;  %v1013_v61 = vadd.f32 %v1012_v26, %v1011_v34  ;;  %v1063_v33 = vmul.f32 %v1484_v1, %v2081_v63 }
 0x1d4   : > { %v1194_v37 = vrot.slane %v1193_v3, 2  ;;  %v1206_v9 = vrot.slane %v1205_v38, 4  ;;  %v1000_v39 = vrot.slane %v999_v6, 1  ;;  %v1006_v48 = vadd.f32 %v1005_v16, %v1004_v2 }
 0x1d5   : > { %v1488_v22 = vpop.eup %1487  ;;  %v1019_v19 = vrot.slane %v1018_v45, 2  ;;  %v1093_v0 = vadd.f32 %v1061_v36, %v1053_v53  ;;  %v1014_v11 = vrot.slane %v1013_v61, 1  ;;  %v1107_v35 = vadd.f32 %v1063_v33, %v1055_v18 }
 0x1d6   : > { %v1062_v20 = vmul.f32 %v1486_v50, %v2081_v63  ;;  %v1064_v55 = vmul.f32 %v1488_v22, %v2081_v63  ;;  %v1001_v58 = vadd.f32 %v1000_v39, %v999_v6  ;;  %v1007_v42 = vrot.slane %v1006_v48, 1 }
 0x1d7   : > { %v1020_v29 = vadd.f32 %v1019_v19, %v1018_v45  ;;  %v1094_v28 = vrot.slane %v1093_v0, 4  ;;  %v1015_v30 = vadd.f32 %v1014_v11, %v1013_v61  ;;  %v1108_v56 = vrot.slane %v1107_v35, 4 }
 0x1d8   : > { %v1100_v17 = vadd.f32 %v1062_v20, %v1054_v46  ;;  %v1114_v4 = vadd.f32 %v1064_v55, %v1056_v32  ;;  %v1008_v12 = vadd.f32 %v1007_v42, %v1006_v48  ;;  %v1195_v41 = vadd.f32 %v1194_v37, %v1193_v3 }
 0x1d9   : > { %v1021_v54 = vrot.slane %v1020_v29, 1  ;;  %v1095_v23 = vadd.f32 %v1094_v28, %v1093_v0  ;;  %v1109_v25 = vadd.f32 %v1108_v56, %v1107_v35  ;;  %v1224_v47 = vsel %vm1219_vm1, %v1958_v5, %v1001_v58 }
 0x1da   : > { %v1101_v15 = vrot.slane %v1100_v17, 4  ;;  %v1115_v8 = vrot.slane %v1114_v4, 4  ;;  %v1207_v34 = vadd.f32 %v1206_v9, %v1205_v38  ;;  %v817_v18 = vadd.f32 %v1908_v57, %v1704_v49 }
 0x1db   : > { %v1022_v53 = vadd.f32 %v1021_v54, %v1020_v29  ;;  %v1096_v43 = vrot.slane %v1095_v23, 2  ;;  %v1110_v40 = vrot.slane %v1109_v25, 2  ;;  %v1226_v31 = vsel %vm1219_vm1, %v1963_v60, %v1015_v30 }
 0x1dc   : > { %v1102_v27 = vadd.f32 %v1101_v15, %v1100_v17  ;;  %v1116_v24 = vadd.f32 %v1115_v8, %v1114_v4  ;;  %v1196_v10 = vrot.slane %v1195_v41, 1  ;;  %v1208_v46 = vrot.slane %v1207_v34, 2 }
 0x1dd   : > { %v1097_v2 = vadd.f32 %v1096_v43, %v1095_v23  ;;  %v1160_v44 = vmul.f32 %v1815_v7, %v1134_v14  ;;  %v1111_v5 = vadd.f32 %v1110_v40, %v1109_v25  ;;  %v1225_v3 = vsel %vm1219_vm1, %v1968_v21, %v1008_v12 }
 0x1de   : > { %v1103_v26 = vrot.slane %v1102_v27, 2  ;;  %v1117_v32 = vrot.slane %v1116_v24, 2  ;;  %v1209_v57 = vadd.f32 %v1208_v46, %v1207_v34  ;;  %v1136_v1 = vmax.f32 %v817_v18, 0.0 }
 0x1df   : > { %v1098_v49 = vrot.slane %v1097_v2, 1  ;;  %v1198_v38 = vadd.f32 %v1160_v44, %v1996_v62  ;;  %v1112_v6 = vrot.slane %v1111_v5, 1  ;;  %v1227_v45 = vsel %vm1219_vm1, %v1974_v51, %v1022_v53 }
 0x1e0   : > { %v1104_v60 = vadd.f32 %v1103_v26, %v1102_v27  ;;  %v1118_v16 = vadd.f32 %v1117_v32, %v1116_v24  ;;  %v1210_v63 = vrot.slane %v1209_v57, 1  ;;  %v1162_v36 = vmul.f32 %v1815_v7, %v1136_v1 }
 0x1e1   : > { %v1099_v52 = vadd.f32 %v1098_v49, %v1097_v2  ;;  %v1199_v14 = vrot.slane %v1198_v38, 4  ;;  %v1113_v50 = vadd.f32 %v1112_v6, %v1111_v5  ;;  %v1197_v21 = vadd.f32 %v1196_v10, %v1195_v41 }
 0x1e2   : > { %v1105_v61 = vrot.slane %v1104_v60, 1  ;;  %v1119_v33 = vrot.slane %v1118_v16, 1  ;;  %v1211_v9 = vadd.f32 %v1210_v63, %v1209_v57  ;;  %v1212_v22 = vadd.f32 %v1162_v36, %v2007_v59 }
 0x1e3   : > { %v1233_v37 = vsel %vm1228_vm2, %v1224_v47, %v1099_v52  ;;  %v1200_v62 = vadd.f32 %v1199_v14, %v1198_v38  ;;  %v1235_v51 = vsel %vm1228_vm2, %v1226_v31, %v1113_v50 }
 0x1e4   : > { %v1106_v39 = vadd.f32 %v1105_v61, %v1104_v60  ;;  %v1120_v48 = vadd.f32 %v1119_v33, %v1118_v16  ;;  %v1242_v19 = vsel %vm1237_vm3, %v1233_v37, %v1197_v21  ;;  %v1244_v0 = vsel %vm1237_vm3, %v1235_v51, %v1211_v9 }
 0x1e5   : > { %v1201_v11 = vrot.slane %v1200_v62, 2  ;;  %v1213_v7 = vrot.slane %v1212_v22, 4  ;;  %v1256_v30 = vadd.f32 %v1877_v13, %v1242_v19  ;;  %v1258_v54 = vadd.f32 %v1877_v13, %v1244_v0 }
 0x1e6   : > { %v1234_v35 = vsel %vm1228_vm2, %v1225_v3, %v1106_v39  ;;  %v1236_v20 = vsel %vm1228_vm2, %v1227_v45, %v1120_v48 }
 0x1e7   : > { %v1202_v55 = vadd.f32 %v1201_v11, %v1200_v62  ;;  %v1214_v58 = vadd.f32 %v1213_v7, %v1212_v22 }
 0x1e9   : > { %v1203_v42 = vrot.slane %v1202_v55, 1  ;;  %v1215_v59 = vrot.slane %v1214_v58, 2 }
 0x1eb   : > { %v1204_v29 = vadd.f32 %v1203_v42, %v1202_v55  ;;  %v1216_v28 = vadd.f32 %v1215_v59, %v1214_v58 }
 0x1ed   : > { %v1243_v56 = vsel %vm1237_vm3, %v1234_v35, %v1204_v29  ;;  %v1217_v17 = vrot.slane %v1216_v28, 1 }
 0x1ee   : > { %v1257_v4 = vadd.f32 %v1877_v13, %v1243_v56 }
 0x1ef   : > { %v1218_v12 = vadd.f32 %v1217_v17, %v1216_v28 }
 0x1f0   : > { %v1270_v23 = vcombine.low %v1256_v30, %v1257_v4 }
 0x1f1   : > { %v1245_v41 = vsel %vm1237_vm3, %v1236_v20, %v1218_v12 }
 0x1f2   : > { %1278 = vst [vmem:[%s1930_s23 + $0x10] sm:$0xff] %v1270_v23  ;;  %v1259_v25 = vadd.f32 %v1877_v13, %v1245_v41 }
 0x1f4   : > { %v1271_v15 = vcombine.low %v1258_v54, %v1259_v25 }
 0x1f6   : > { %1279 = vst [vmem:[%s1930_s23 + $0x18] sm:$0xff] %v1271_v15 }
 0x1f7 PF: > { %s17_s26 = sadd.s32 1, %s1511_s26   ;;  %s2082_s24 = smov %s1507_s25 }
 0x1f8   : > { %p14_p5 = scmp.ge.s32.totalorder %s17_s26, 4   ;;  %s2083_s25 = smov %s2085_s27 }
 0x1fa   :  { %16 = sbr.rel (!%p14_p5) target bundleno = 2 (0x2), region = 78 }

</bundles_post_ra>
